<compile_context>
chip_gen: v7x
topology: tpu7x:2x2x1
jax: 0.10.0
libtpu: 0.0.40
codegen_flags: <defaults>
</compile_context>

<pallas_src>
import functools

import jax
import jax.numpy as jnp
from jax import lax
from jax.experimental import pallas as pl
from jax.experimental.pallas import tpu as pltpu

_MIB = 1024 * 1024


def _round_up(x, m):
    return (x + m - 1) // m * m


def _vmem_capacity_bytes():
    try:
        info = pltpu.get_tpu_info()
        cap = getattr(info, "vmem_capacity_bytes", None)
        if cap:
            return int(cap)
    except Exception:
        pass
    return 128 * _MIB  # v5e / v6e default


def _indexing_head_kernel(hoist_rel, ent_ref, rel_ref,
                          w_ent_ref, b_ent_ref, w_rel_ref, b_rel_ref,
                          out_ref, rel2_ref):
    bt, n_ent_t, d_p = ent_ref.shape
    _, n_rel_p, _ = rel_ref.shape
    h_p = w_ent_ref.shape[1]
    mm_dtype = rel2_ref.dtype

    def compute_rel2():
        # ReLU + Linear for the rel branch; the 1/sqrt(H) scale is already
        # folded into w_rel / b_rel by the wrapper.  Flattened (bt*N_rel, D)
        # matmul so every batch element feeds the MXU M dimension.
        rel = jnp.maximum(rel_ref[...], 0.0).reshape(bt * n_rel_p, d_p)
        rel2 = jnp.dot(rel, w_rel_ref[...],
                       preferred_element_type=jnp.float32) + b_rel_ref[...]
        rel2_ref[...] = rel2.reshape(bt, n_rel_p, h_p).astype(mm_dtype)

    if hoist_rel:
        # rel block is grid-invariant along the entity axis (index_map
        # (b, 0, 0)): compute it once per batch block; the entity axis is
        # "arbitrary" so the VMEM scratch persists across e-steps.
        @pl.when(pl.program_id(1) == 0)
        def _():
            compute_rel2()
    else:
        compute_rel2()

    ent = jnp.maximum(ent_ref[...], 0.0).reshape(bt * n_ent_t, d_p)
    ent2 = jnp.dot(ent, w_ent_ref[...],
                   preferred_element_type=jnp.float32) + b_ent_ref[...]
    ent2 = ent2.reshape(bt, n_ent_t, h_p).astype(mm_dtype)

    # Batched rel2 @ ent2^T as a last-dim contraction (batch dims (0,0)) so
    # the MXU consumes ent2 directly -- no XLU transpose.  f32 accumulation.
    attn = lax.dot_general(
        rel2_ref[...], ent2,
        dimension_numbers=(((2,), (2,)), ((0,), (0,))),
        preferred_element_type=jnp.float32)
    out_ref[...] = attn.astype(out_ref.dtype)


def _choose_tiles(B, n_ent_p, n_rel_p, d_p, h_p,
                  in_itemsize, mm_itemsize, out_itemsize,
                  budget_bytes, two_core):
    """Pick (batch block bt, entity tile te) so the per-step footprint fits."""

    def footprint(bt, te):
        io_blocks = (bt * (te + n_rel_p) * d_p * in_itemsize      # ent + rel in
                     + bt * n_rel_p * te * out_itemsize)           # out block
        weights = 2 * d_p * h_p * in_itemsize + 2 * h_p * 4        # W (ent+rel) + f32 biases
        relu_tmp = bt * (te + n_rel_p) * d_p * in_itemsize         # ReLU'd copies
        lin_f32 = bt * (te + n_rel_p) * h_p * 4                    # f32 ent2/rel2 accum
        mm_cast = bt * (te + n_rel_p) * h_p * mm_itemsize          # casts fed to attn dot
        attn_f32 = bt * n_rel_p * te * 4                           # f32 attn before store
        scratch = bt * n_rel_p * h_p * mm_itemsize                 # persistent rel2 scratch
        return (2 * (io_blocks + weights)                          # double-buffered pipeline
                + relu_tmp + lin_f32 + mm_cast + attn_f32 + scratch)

    bt, te = B, n_ent_p
    while te > 128 and footprint(bt, te) > budget_bytes:
        te = _round_up(te // 2, 128)
    while bt > 1 and footprint(bt, te) > budget_bytes:
        bt = (bt + 1) // 2

    # v7x has 2 TensorCores/chip: guarantee >= 2 slices on a "parallel" axis.
    # Prefer splitting batch (keeps the rel-branch hoist); fall back to
    # splitting the entity axis when B == 1.
    if two_core and _round_up(B, bt) // bt < 2:
        if B >= 2:
            bt = (B + 1) // 2
        elif te == n_ent_p and n_ent_p >= 256:
            te = _round_up(n_ent_p // 2, 128)
    return bt, te


def entities_indexing_head(entities_features, rel_features,
                           w_ent, b_ent, w_rel, b_rel,
                           *, compute_dtype=jnp.bfloat16,
                           out_dtype=jnp.float32,
                           vmem_budget_bytes=None,
                           block_b=None, block_e=None):
    """entities_features: (B, N_ent, D); rel_features: (B, N_rel, D)
       w_*: (D, 2D) laid out (in, out); b_*: (1, 2D)
       -> (B, N_rel, N_ent) in out_dtype (default float32)."""
    B, N_ent, D = entities_features.shape
    B2, N_rel, D2 = rel_features.shape
    H = w_ent.shape[1]
    assert B == B2 and D == D2 and H == 2 * D
    scaling = float(H) ** (-0.5)

    # --- generation-aware, mutually consistent VMEM budget / scoped limit ---
    cap = _vmem_capacity_bytes()
    two_core = cap <= 64 * _MIB               # v7x: 64 MiB/TC and 2 TCs/chip
    if vmem_budget_bytes is None:
        vmem_budget_bytes = 40 * _MIB if two_core else 96 * _MIB
    vmem_limit_bytes = int(min(vmem_budget_bytes + 8 * _MIB, cap))

    # Fold the 1/sqrt(H) scale into the rel Linear, in f32, before any
    # downcast: strictly less work than scaling rel2 (or attn) in-kernel.
    w_rel = w_rel * scaling
    b_rel = b_rel * scaling

    # bf16 compute (default): halves activation/weight DMA and runs the MXU
    # on its fast path (v5e/v6e/v7x); accumulation stays f32. Biases stay f32
    # so the accumulator add is exact.
    if compute_dtype is None:
        compute_dtype = entities_features.dtype
    compute_dtype = jnp.dtype(compute_dtype)
    entities_features = entities_features.astype(compute_dtype)
    rel_features = rel_features.astype(compute_dtype)
    w_ent = w_ent.astype(compute_dtype)
    w_rel = w_rel.astype(compute_dtype)
    b_ent = b_ent.astype(jnp.float32)
    b_rel = b_rel.astype(jnp.float32)

    in_itemsize = compute_dtype.itemsize
    mm_itemsize = compute_dtype.itemsize
    out_itemsize = jnp.dtype(out_dtype).itemsize

    # --- pad everything to full (8, 128) tiles (exact: zero padding) --------
    d_p = _round_up(D, 128)          # lane dim of features / sublane of W
    h_p = _round_up(H, 128)          # lane dim of W, bias, ent2/rel2
    n_ent_p = _round_up(N_ent, 128)  # becomes the output lane dim
    n_rel_p = _round_up(N_rel, 8)    # output sublane dim

    bt, te = _choose_tiles(B, n_ent_p, n_rel_p, d_p, h_p,
                           in_itemsize, mm_itemsize, out_itemsize,
                           vmem_budget_bytes, two_core)
    if block_b is not None:
        bt = block_b
    if block_e is not None:
        te = block_e
    bt = max(1, min(bt, B))
    te = _round_up(te, 128)

    b_p = _round_up(B, bt)
    n_ent_p = _round_up(n_ent_p, te)
    grid_b = b_p // bt
    grid_e = n_ent_p // te

    # Dimension semantics + rel-branch hoist decision:
    #  * batch axis splittable -> batch "parallel" (feeds v7x's 2 cores),
    #    entity "arbitrary" so the rel2 scratch is valid across e-steps.
    #  * batch not splittable on a 2-core chip -> entity "parallel" so both
    #    cores get work; rel branch is recomputed per entity slice.
    #  * otherwise (single step / single core) -> "arbitrary" + hoist.
    if grid_b >= 2:
        sems = ("parallel", "arbitrary")
        hoist_rel = True
    elif two_core and grid_e >= 2:
        sems = ("parallel", "parallel")
        hoist_rel = False
    else:
        sems = ("arbitrary", "arbitrary")
        hoist_rel = True

    ent_p = jnp.pad(entities_features,
                    ((0, b_p - B), (0, n_ent_p - N_ent), (0, d_p - D)))
    rel_p = jnp.pad(rel_features,
                    ((0, b_p - B), (0, n_rel_p - N_rel), (0, d_p - D)))
    w_ent_p = jnp.pad(w_ent, ((0, d_p - D), (0, h_p - H)))
    w_rel_p = jnp.pad(w_rel, ((0, d_p - D), (0, h_p - H)))
    b_ent_p = jnp.pad(b_ent, ((0, 0), (0, h_p - H)))
    b_rel_p = jnp.pad(b_rel, ((0, 0), (0, h_p - H)))

    kernel = functools.partial(_indexing_head_kernel, hoist_rel)

    out_padded = pl.pallas_call(
        kernel,
        out_shape=jax.ShapeDtypeStruct((b_p, n_rel_p, n_ent_p), out_dtype),
        grid_spec=pltpu.PrefetchScalarGridSpec(
            num_scalar_prefetch=0,
            grid=(grid_b, grid_e),
            in_specs=[
                pl.BlockSpec((bt, te, d_p), lambda b, e: (b, e, 0)),       # ent
                pl.BlockSpec((bt, n_rel_p, d_p), lambda b, e: (b, 0, 0)),  # rel
                pl.BlockSpec((d_p, h_p), lambda b, e: (0, 0)),             # W_ent
                pl.BlockSpec((1, h_p), lambda b, e: (0, 0)),               # b_ent
                pl.BlockSpec((d_p, h_p), lambda b, e: (0, 0)),             # W_rel
                pl.BlockSpec((1, h_p), lambda b, e: (0, 0)),               # b_rel
            ],
            out_specs=pl.BlockSpec((bt, n_rel_p, te), lambda b, e: (b, 0, e)),
            scratch_shapes=[pltpu.VMEM((bt, n_rel_p, h_p), compute_dtype)],
        ),
        compiler_params=pltpu.CompilerParams(
            dimension_semantics=sems,
            vmem_limit_bytes=vmem_limit_bytes,
        ),
    )(ent_p, rel_p, w_ent_p, b_ent_p, w_rel_p, b_rel_p)

    # Padded entity/relation rows produce bias-only garbage rows/cols: drop.
    return out_padded[:B, :N_rel, :N_ent]


def _reference(entities_features, rel_features, w_ent, b_ent, w_rel, b_rel):
    H = w_ent.shape[1]
    scaling = float(H) ** (-0.5)
    ent2 = jnp.maximum(entities_features, 0.0) @ w_ent + b_ent
    rel2 = jnp.maximum(rel_features, 0.0) @ w_rel + b_rel
    return jnp.einsum("brh,beh->bre", rel2, ent2) * scaling


if __name__ == "__main__":
    # cfg.MODEL.REL_DETR.TRANSFORMER.D_MODEL -> D; hidden = 2*D
    B, N_ent, N_rel, D = 2, 16, 8, 32
    H = 2 * D

    key = jax.random.PRNGKey(0)
    k_ent, k_rel, k_we, k_be, k_wr, k_br = jax.random.split(key, 6)

    entities_features = jax.random.normal(k_ent, (B, N_ent, D), jnp.float32)
    rel_features = jax.random.normal(k_rel, (B, N_rel, D), jnp.float32)

    # Deterministic synthetic Linear parameters (stored as (in, out) / (1, out)).
    bound = 1.0 / (D ** 0.5)
    w_ent = jax.random.uniform(k_we, (D, H), jnp.float32, -bound, bound)
    b_ent = jax.random.uniform(k_be, (1, H), jnp.float32, -bound, bound)
    w_rel = jax.random.uniform(k_wr, (D, H), jnp.float32, -bound, bound)
    b_rel = jax.random.uniform(k_br, (1, H), jnp.float32, -bound, bound)

    ref = _reference(entities_features, rel_features, w_ent, b_ent, w_rel, b_rel)

    # 1) f32 compute path: exact-ish, tight tolerance.
    out_f32 = jax.block_until_ready(
        entities_indexing_head(entities_features, rel_features,
                               w_ent, b_ent, w_rel, b_rel,
                               compute_dtype=jnp.float32))
    assert out_f32.shape == (B, N_rel, N_ent)
    assert jnp.allclose(out_f32, ref, atol=1e-4, rtol=1e-4)

    # 2) default bf16 mixed-precision path (f32 accumulation), looser tolerance.
    out_bf16 = jax.block_until_ready(
        entities_indexing_head(entities_features, rel_features,
                               w_ent, b_ent, w_rel, b_rel))
    assert out_bf16.shape == (B, N_rel, N_ent)
    assert jnp.allclose(out_bf16, ref, atol=5e-2, rtol=5e-2)

    # 3) multi-tile grid: forces the batch-parallel / entity-"arbitrary"
    #    rel2-hoist path (pl.when + VMEM scratch reuse across entity tiles).
    N_ent_big = 256
    ent_big = jax.random.normal(k_ent, (B, N_ent_big, D), jnp.float32)
    ref_big = _reference(ent_big, rel_features, w_ent, b_ent, w_rel, b_rel)
    out_big = jax.block_until_ready(
        entities_indexing_head(ent_big, rel_features,
                               w_ent, b_ent, w_rel, b_rel,
                               compute_dtype=jnp.float32,
                               block_b=1, block_e=128))
    assert out_big.shape == (B, N_rel, N_ent_big)
    assert jnp.allclose(out_big, ref_big, atol=1e-4, rtol=1e-4)

    print("KERNEL_OK")
</pallas_src>

<mosaic_0001>
module attributes {stable_mosaic.version = 11 : i64} {
  func.func @_indexing_head_kernel(%arg0: i32, %arg1: i32, %arg2: memref<2x128x128xf32, #tpu.memory_space<vmem>>, %arg3: memref<2x8x128xf32, #tpu.memory_space<vmem>>, %arg4: memref<128x128xf32, #tpu.memory_space<vmem>>, %arg5: memref<1x128xf32, #tpu.memory_space<vmem>>, %arg6: memref<128x128xf32, #tpu.memory_space<vmem>>, %arg7: memref<1x128xf32, #tpu.memory_space<vmem>>, %arg8: memref<2x8x128xf32, #tpu.memory_space<vmem>>, %arg9: memref<2x8x128xf32, #tpu.memory_space<vmem>>) attributes {dimension_semantics = [#tpu.dimension_semantics<arbitrary>, #tpu.dimension_semantics<arbitrary>], iteration_bounds = array<i64: 1, 1>, scalar_prefetch = 0 : i64, scratch_operands = 1 : i64, tpu.core_type = #tpu.core_type<tc>, window_params = [{transform_indices = @transform_0, window_bounds = array<i64: 2, 128, 128>}, {transform_indices = @transform_1, window_bounds = array<i64: 2, 8, 128>}, {pipeline_mode = #tpu.pipeline_mode<synchronous>, transform_indices = @transform_2, window_bounds = array<i64: 128, 128>}, {pipeline_mode = #tpu.pipeline_mode<synchronous>, transform_indices = @transform_3, window_bounds = array<i64: 1, 128>}, {pipeline_mode = #tpu.pipeline_mode<synchronous>, transform_indices = @transform_4, window_bounds = array<i64: 128, 128>}, {pipeline_mode = #tpu.pipeline_mode<synchronous>, transform_indices = @transform_5, window_bounds = array<i64: 1, 128>}, {transform_indices = @transform_6, window_bounds = array<i64: 2, 8, 128>}]} {
    %c0_i32 = arith.constant 0 : i32
    %0 = arith.cmpi eq, %arg1, %c0_i32 : i32
    %1 = arith.extui %0 : i1 to i32
    %c0_i32_0 = arith.constant 0 : i32
    %2 = arith.cmpi ne, %1, %c0_i32_0 : i32
    scf.if %2 {
      %c0_15 = arith.constant 0 : index
      %c0_16 = arith.constant 0 : index
      %c0_17 = arith.constant 0 : index
      %16 = vector.load %arg3[%c0_15, %c0_16, %c0_17] : memref<2x8x128xf32, #tpu.memory_space<vmem>>, vector<2x8x128xf32>
      %cst_18 = arith.constant 0.000000e+00 : f32
      %17 = vector.broadcast %cst_18 : f32 to vector<2x8x128xf32>
      %18 = arith.maximumf %16, %17 : vector<2x8x128xf32>
      %19 = vector.shape_cast %18 : vector<2x8x128xf32> to vector<16x128xf32>
      %c0_19 = arith.constant 0 : index
      %c0_20 = arith.constant 0 : index
      %20 = vector.load %arg6[%c0_19, %c0_20] : memref<128x128xf32, #tpu.memory_space<vmem>>, vector<128x128xf32>
      %cst_21 = arith.constant dense<0.000000e+00> : vector<16x128xf32>
      %21 = tpu.matmul %19, %20, %cst_21 {dimension_numbers = #tpu.dot_dimension_numbers<[1], [0], [0], [1], [0, 0, 1, 1], [], []>} : vector<16x128xf32>, vector<128x128xf32>, vector<16x128xf32> -> vector<16x128xf32>
      %c0_22 = arith.constant 0 : index
      %c0_23 = arith.constant 0 : index
      %22 = vector.load %arg7[%c0_22, %c0_23] : memref<1x128xf32, #tpu.memory_space<vmem>>, vector<1x128xf32>
      %23 = vector.broadcast %22 : vector<1x128xf32> to vector<16x128xf32>
      %24 = arith.addf %21, %23 : vector<16x128xf32>
      %25 = vector.shape_cast %24 : vector<16x128xf32> to vector<2x8x128xf32>
      %c0_24 = arith.constant 0 : index
      %c0_25 = arith.constant 0 : index
      %c0_26 = arith.constant 0 : index
      %26 = vector.load %arg9[%c0_24, %c0_25, %c0_26] : memref<2x8x128xf32, #tpu.memory_space<vmem>>, vector<2x8x128xf32>
      tpu.vector_store %arg9[%c0_24, %c0_25, %c0_26], %25 {strides = array<i32>} : memref<2x8x128xf32, #tpu.memory_space<vmem>>, vector<2x8x128xf32>,
    } else {
    }
    %c0 = arith.constant 0 : index
    %c0_1 = arith.constant 0 : index
    %c0_2 = arith.constant 0 : index
    %3 = vector.load %arg2[%c0, %c0_1, %c0_2] : memref<2x128x128xf32, #tpu.memory_space<vmem>>, vector<2x128x128xf32>
    %cst = arith.constant 0.000000e+00 : f32
    %4 = vector.broadcast %cst : f32 to vector<2x128x128xf32>
    %5 = arith.maximumf %3, %4 : vector<2x128x128xf32>
    %6 = vector.shape_cast %5 : vector<2x128x128xf32> to vector<256x128xf32>
    %c0_3 = arith.constant 0 : index
    %c0_4 = arith.constant 0 : index
    %7 = vector.load %arg4[%c0_3, %c0_4] : memref<128x128xf32, #tpu.memory_space<vmem>>, vector<128x128xf32>
    %cst_5 = arith.constant dense<0.000000e+00> : vector<256x128xf32>
    %8 = tpu.matmul %6, %7, %cst_5 {dimension_numbers = #tpu.dot_dimension_numbers<[1], [0], [0], [1], [0, 0, 1, 1], [], []>} : vector<256x128xf32>, vector<128x128xf32>, vector<256x128xf32> -> vector<256x128xf32>
    %c0_6 = arith.constant 0 : index
    %c0_7 = arith.constant 0 : index
    %9 = vector.load %arg5[%c0_6, %c0_7] : memref<1x128xf32, #tpu.memory_space<vmem>>, vector<1x128xf32>
    %10 = vector.broadcast %9 : vector<1x128xf32> to vector<256x128xf32>
    %11 = arith.addf %8, %10 : vector<256x128xf32>
    %12 = vector.shape_cast %11 : vector<256x128xf32> to vector<2x128x128xf32>
    %c0_8 = arith.constant 0 : index
    %c0_9 = arith.constant 0 : index
    %c0_10 = arith.constant 0 : index
    %13 = vector.load %arg9[%c0_8, %c0_9, %c0_10] : memref<2x8x128xf32, #tpu.memory_space<vmem>>, vector<2x8x128xf32>
    %cst_11 = arith.constant dense<0.000000e+00> : vector<2x8x128xf32>
    %14 = tpu.matmul %13, %12, %cst_11 {dimension_numbers = #tpu.dot_dimension_numbers<[2], [2], [1], [1], [0, 0, 0, 1, 1, 1], [0], [0]>} : vector<2x8x128xf32>, vector<2x128x128xf32>, vector<2x8x128xf32> -> vector<2x8x128xf32>
    %c0_12 = arith.constant 0 : index
    %c0_13 = arith.constant 0 : index
    %c0_14 = arith.constant 0 : index
    %15 = vector.load %arg8[%c0_12, %c0_13, %c0_14] : memref<2x8x128xf32, #tpu.memory_space<vmem>>, vector<2x8x128xf32>
    tpu.vector_store %arg8[%c0_12, %c0_13, %c0_14], %14 {strides = array<i32>} : memref<2x8x128xf32, #tpu.memory_space<vmem>>, vector<2x8x128xf32>,
    return
  }
  func.func @transform_0(%arg0: i32, %arg1: i32) -> (i32, i32, i32) {
    %c0_i32 = arith.constant 0 : i32
    %c0_i32_0 = arith.constant 0 : i32
    return %arg0, %arg1, %c0_i32 : i32, i32, i32
  }
  func.func @transform_1(%arg0: i32, %arg1: i32) -> (i32, i32, i32) {
    %c0_i32 = arith.constant 0 : i32
    %c0_i32_0 = arith.constant 0 : i32
    %c0_i32_1 = arith.constant 0 : i32
    return %arg0, %c0_i32, %c0_i32_0 : i32, i32, i32
  }
  func.func @transform_2(%arg0: i32, %arg1: i32) -> (i32, i32) {
    %c0_i32 = arith.constant 0 : i32
    %c0_i32_0 = arith.constant 0 : i32
    %c0_i32_1 = arith.constant 0 : i32
    return %c0_i32, %c0_i32_0 : i32, i32
  }
  func.func @transform_3(%arg0: i32, %arg1: i32) -> (i32, i32) {
    %c0_i32 = arith.constant 0 : i32
    %c0_i32_0 = arith.constant 0 : i32
    %c0_i32_1 = arith.constant 0 : i32
    return %c0_i32, %c0_i32_0 : i32, i32
  }
  func.func @transform_4(%arg0: i32, %arg1: i32) -> (i32, i32) {
    %c0_i32 = arith.constant 0 : i32
    %c0_i32_0 = arith.constant 0 : i32
    %c0_i32_1 = arith.constant 0 : i32
    return %c0_i32, %c0_i32_0 : i32, i32
  }
  func.func @transform_5(%arg0: i32, %arg1: i32) -> (i32, i32) {
    %c0_i32 = arith.constant 0 : i32
    %c0_i32_0 = arith.constant 0 : i32
    %c0_i32_1 = arith.constant 0 : i32
    return %c0_i32, %c0_i32_0 : i32, i32
  }
  func.func @transform_6(%arg0: i32, %arg1: i32) -> (i32, i32, i32) {
    %c0_i32 = arith.constant 0 : i32
    %c0_i32_0 = arith.constant 0 : i32
    return %arg0, %c0_i32, %arg1 : i32, i32, i32
  }
}

</mosaic_0001>

<bundles_post_ra>
// kernel: tpu_custom_call.1
= control target key start
LH: loop header
LB: loop body
LE: loop exit
PB: predicated region body
PF: predicated region fallthrough
CT: control target
= control target key end

     0   :  { %11 = vsyncpa [#allocation4], 0  ;;  %s1478_s0 = inlined_call_operand.hbm [shape: f32[2,128,128], index: 0, kind: input, shape index: {}]   ;;  %s1479_s1 = inlined_call_operand.hbm [shape: f32[2,8,128], index: 1, kind: input, shape index: {}]   ;;  %s1480_s2 = inlined_call_operand.hbm [shape: f32[128,128], index: 2, kind: input, shape index: {}]   ;;  %s1481_s3 = inlined_call_operand.hbm [shape: f32[1,128], index: 3, kind: input, shape index: {}]   ;;  %s1482_s4 = inlined_call_operand.hbm [shape: f32[128,128], index: 4, kind: input, shape index: {}]   ;;  %s1483_s5 = inlined_call_operand.hbm [shape: f32[1,128], index: 5, kind: input, shape index: {}]   ;;  %s1484_s6 = inlined_call_operand.hbm [shape: f32[2,8,128], index: 6, kind: output, shape index: {}]  }
   0x1   :  { %12 = vsyncpa [#allocation7], 0 }
   0x2   :  { %13 = vsyncpa [#allocation10], 0 }
   0x3   :  { %14 = vsyncpa [#allocation13], 0 }
   0x4   :  { %15 = vsyncpa [#allocation5], 0  ;;  %s1261_s21 = smov [#allocation6]   ;;  %s1262_s23 = smov [#allocation9]  }
   0x5   :  { %s33_s22 = sshll.u32 %s1261_s21, 4  ;;  %s58_s24 = sshll.u32 %s1262_s23, 4  ;;  %s34_s22 = int_to_ptr.vmem [resolvable:$true] %s33_s22  ;;  %s1308_s24 = int_to_ptr.vmem [resolvable:$true] %s58_s24 }
   0x6   :  { %s1097_s27 = scalar_lea.hbm %s1479_s1, 256 }
   0x7   :  { %p1098_p0 = scmp.ne.s32.totalorder %s1479_s1, %s1097_s27  ;;  %p1101_p1 = scmp.lt.u32.totalorder %s1097_s27, %s1479_s1 }
   0x9   :  { %p1103_p2 = pnand %p1101_p1, %p1098_p0 }
   0xb   :  { %1106 = shalt.err (!%p1103_p2)
}
   0xc   :  { %s1107_s8 = scalar_lea.vmem %s34_s22, 256  ;;  %p1112_p4 = scmp.lt.s32.totalorder %s34_s22, %s34_s22 }
   0xd   :  { %p1108_p3 = scmp.ne.s32.totalorder %s34_s22, %s1107_s8  ;;  %p1113_p5 = scmp.lt.s32.totalorder %s1107_s8, %s1107_s8 }
   0xf   :  { %p1114_p6 = por %p1113_p5, %p1112_p4 }
  0x11   :  { %p1115_p7 = pnand %p1114_p6, %p1108_p3 }
  0x13   :  { %1118 = shalt.err (!%p1115_p7)
}
  0x14   :  { %s1263_s9 = smov 128   ;;  %s1264_s10 = smov 8  }
  0x15   :  { %39 = dma.hbm_to_vmem [thread:$0]  %s1479_s1, 256, %s34_s22, [#allocation7], %s1263_s9, %s1263_s9, %s1264_s10  }
  0x16   :  { %s1119_s15 = scalar_lea.hbm %s1481_s3, 16 }
  0x17   :  { %p1120_p8 = scmp.ne.s32.totalorder %s1481_s3, %s1119_s15  ;;  %p1123_p9 = scmp.lt.u32.totalorder %s1119_s15, %s1481_s3 }
  0x19   :  { %p1125_p10 = pnand %p1123_p9, %p1120_p8 }
  0x1b   :  { %1128 = shalt.err (!%p1125_p10)
}
  0x1c   :  { %s1129_s20 = scalar_lea.vmem %s1308_s24, 16  ;;  %s1133_s1 = scalar_lea.vmem %s1308_s24, 32 }
  0x1d   :  { %p1130_p11 = scmp.ne.s32.totalorder %s1308_s24, %s1129_s20  ;;  %p1134_p12 = scmp.lt.s32.totalorder %s1308_s24, %s1308_s24 }
  0x1e   :  { %p1135_p13 = scmp.lt.s32.totalorder %s1133_s1, %s1129_s20 }
  0x20   :  { %p1136_p0 = por %p1135_p13, %p1134_p12 }
  0x22   :  { %p1137_p1 = pnand %p1136_p0, %p1130_p11 }
  0x24   :  { %1140 = shalt.err (!%p1137_p1)
}
  0x25   :  { %61 = dma.hbm_to_vmem [thread:$0]  %s1481_s3, 16, %s1308_s24, [#allocation10]  }
  0x26   :  { %s1265_s23 = smov [#allocation3]   ;;  %s1266_s26 = smov [#allocation8]  }
  0x27   :  { %s21_s25 = sshll.u32 %s1265_s23, 4  ;;  %s45_s27 = sshll.u32 %s1266_s26, 4  ;;  %s22_s25 = int_to_ptr.vmem [resolvable:$true] %s21_s25  ;;  %s1343_s27 = int_to_ptr.vmem [resolvable:$true] %s45_s27 }
  0x28   :  { %s1141_s30 = scalar_lea.hbm %s1478_s0, 4096 }
  0x29   :  { %p1142_p2 = scmp.ne.s32.totalorder %s1478_s0, %s1141_s30  ;;  %p1145_p3 = scmp.lt.u32.totalorder %s1141_s30, %s1478_s0 }
  0x2b   :  { %p1147_p4 = pnand %p1145_p3, %p1142_p2 }
  0x2d   :  { %1150 = shalt.err (!%p1147_p4)
}
  0x2e   :  { %s1151_s3 = scalar_lea.vmem %s22_s25, 4096  ;;  %p1156_p6 = scmp.lt.s32.totalorder %s22_s25, %s22_s25 }
  0x2f   :  { %p1152_p5 = scmp.ne.s32.totalorder %s22_s25, %s1151_s3  ;;  %p1157_p7 = scmp.lt.s32.totalorder %s1151_s3, %s1151_s3 }
  0x31   :  { %p1158_p8 = por %p1157_p7, %p1156_p6 }
  0x33   :  { %p1159_p9 = pnand %p1158_p8, %p1152_p5 }
  0x35   :  { %1162 = shalt.err (!%p1159_p9)
}
  0x36   :  { %27 = dma.hbm_to_vmem [thread:$0]  %s1478_s0, 4096, %s22_s25, [#allocation4], %s1263_s9, %s1263_s9, %s1264_s10  }
  0x37   :  { %s1163_s16 = scalar_lea.hbm %s1480_s2, 2048 }
  0x38   :  { %p1164_p10 = scmp.ne.s32.totalorder %s1480_s2, %s1163_s16  ;;  %p1167_p11 = scmp.lt.u32.totalorder %s1163_s16, %s1480_s2 }
  0x3a   :  { %p1169_p12 = pnand %p1167_p11, %p1164_p10 }
  0x3c   :  { %1172 = shalt.err (!%p1169_p12)
}
  0x3d   :  { %s1173_s1 = scalar_lea.vmem %s1343_s27, 2048  ;;  %p1178_p0 = scmp.lt.s32.totalorder %s1343_s27, %s1343_s27 }
  0x3e   :  { %p1174_p13 = scmp.ne.s32.totalorder %s1343_s27, %s1173_s1  ;;  %p1179_p1 = scmp.lt.s32.totalorder %s1173_s1, %s1173_s1 }
  0x40   :  { %p1180_p2 = por %p1179_p1, %p1178_p0 }
  0x42   :  { %p1181_p3 = pnand %p1180_p2, %p1174_p13 }
  0x44   :  { %1184 = shalt.err (!%p1181_p3)
}
  0x45   :  { %51 = dma.hbm_to_vmem [thread:$0]  %s1480_s2, 2048, %s1343_s27, [#allocation7], %s1263_s9, %s1263_s9, %s1264_s10  }
  0x46   :  { %s1267_s22 = smov [#allocation11]   ;;  %s1268_s25 = smov [#allocation12]  }
  0x47   :  { %s67_s23 = sshll.u32 %s1267_s22, 4  ;;  %s80_s26 = sshll.u32 %s1268_s25, 4  ;;  %s68_s23 = int_to_ptr.vmem [resolvable:$true] %s67_s23  ;;  %s81_s26 = int_to_ptr.vmem [resolvable:$true] %s80_s26 }
  0x48   :  { %s1185_s30 = scalar_lea.hbm %s1482_s4, 2048 }
  0x49   :  { %p1186_p4 = scmp.ne.s32.totalorder %s1482_s4, %s1185_s30  ;;  %p1189_p5 = scmp.lt.u32.totalorder %s1185_s30, %s1482_s4 }
  0x4b   :  { %p1191_p6 = pnand %p1189_p5, %p1186_p4 }
  0x4d   :  { %1194 = shalt.err (!%p1191_p6)
}
  0x4e   :  { %s1195_s2 = scalar_lea.vmem %s68_s23, 2048  ;;  %p1200_p8 = scmp.lt.s32.totalorder %s68_s23, %s68_s23 }
  0x4f   :  { %p1196_p7 = scmp.ne.s32.totalorder %s68_s23, %s1195_s2  ;;  %p1201_p9 = scmp.lt.s32.totalorder %s1195_s2, %s1195_s2 }
  0x51   :  { %p1202_p10 = por %p1201_p9, %p1200_p8 }
  0x53   :  { %p1203_p11 = pnand %p1202_p10, %p1196_p7 }
  0x55   :  { %1206 = shalt.err (!%p1203_p11)
}
  0x56   :  { %73 = dma.hbm_to_vmem [thread:$0]  %s1482_s4, 2048, %s68_s23, [#allocation10], %s1263_s9, %s1263_s9, %s1264_s10  }
  0x57   :  { %s1207_s14 = scalar_lea.hbm %s1483_s5, 16 }
  0x58   :  { %p1208_p12 = scmp.ne.s32.totalorder %s1483_s5, %s1207_s14  ;;  %p1211_p13 = scmp.lt.u32.totalorder %s1207_s14, %s1483_s5 }
  0x5a   :  { %p1213_p0 = pnand %p1211_p13, %p1208_p12 }
  0x5c   :  { %1216 = shalt.err (!%p1213_p0)
}
  0x5d   :  { %s1217_s19 = scalar_lea.vmem %s81_s26, 16  ;;  %s1221_s20 = scalar_lea.vmem %s81_s26, 32 }
  0x5e   :  { %p1218_p1 = scmp.ne.s32.totalorder %s81_s26, %s1217_s19  ;;  %p1222_p2 = scmp.lt.s32.totalorder %s81_s26, %s81_s26 }
  0x5f   :  { %p1223_p3 = scmp.lt.s32.totalorder %s1221_s20, %s1217_s19 }
  0x61   :  { %p1224_p4 = por %p1223_p3, %p1222_p2 }
  0x63   :  { %p1225_p5 = pnand %p1224_p4, %p1218_p1 }
  0x65   :  { %1228 = shalt.err (!%p1225_p5)
}
  0x66   :  { %83 = dma.hbm_to_vmem [thread:$0]  %s1483_s5, 16, %s81_s26, [#allocation13]  }
  0x67   :  { %1251 = dma.done.wait [#allocation4], 4096  }
  0x68   :  { %1252 = vsyncadd [#allocation4], 4294963200 }
  0x69   :  { %1253 = dma.done.wait [#allocation7], 2304  }
  0x6a   :  { %1254 = vsyncadd [#allocation7], 4294964992 }
  0x6b   :  { %1255 = dma.done.wait [#allocation10], 2064  }
  0x6c   :  { %1256 = vsyncadd [#allocation10], 4294965232 }
  0x6d   :  { %1257 = dma.done.wait [#allocation13], 16  }
  0x6e   :  { %1258 = vsyncadd [#allocation13], 4294967280  ;;  %v274_v0 = vld [vmem:[#allocation8] sm:$0xff]  ;;  %v275_v1 = vld [vmem:[#allocation8 + $0x8] sm:$0xff]  ;;  %vm1270_vm0 = vmmov 0   ;;  %s1272_s5 = smov [#allocation14]  }
  0x6f   :  { %v276_v2 = vld [vmem:[#allocation8 + $0x10] sm:$0xff]  ;;  %v1005_v3 = vpack.c.bf16 %v275_v1, %v274_v0  ;;  %v277_v4 = vld [vmem:[#allocation8 + $0x18] sm:$0xff]  ;;  %v278_v6 = vld [vmem:[#allocation8 + $0x20] sm:$0xff]  ;;  %s671_s0 = sshll.u32 %s1272_s5, 4  ;;  %s672_s0 = int_to_ptr.vmem [resolvable:$true] %s671_s0 }
  0x70   :  { %v1009_v5 = vpack.c.bf16 %v277_v4, %v276_v2  ;;  %v279_v7 = vld [vmem:[#allocation8 + $0x28] sm:$0xff]  ;;  %v210_v9 = vld [vmem:[#allocation3] sm:$0xff]  ;;  %v281_v11 = vld [vmem:[#allocation8 + $0x38] sm:$0xff]  ;;  %s1229_s21 = scalar_lea.vmem %s672_s0, 256  ;;  %p1234_p7 = scmp.lt.s32.totalorder %s672_s0, %s672_s0 }
  0x71   :  { %1006 = vmatprep.subr.bf16.mxu1 %v1005_v3  ;;  %v1013_v8 = vpack.c.bf16 %v279_v7, %v278_v6  ;;  %v280_v10 = vld [vmem:[#allocation8 + $0x30] sm:$0xff]  ;;  %v242_v12 = vmax.f32 %v210_v9, 0.0  ;;  %v282_v14 = vld [vmem:[#allocation8 + $0x40] sm:$0xff]  ;;  %v283_v15 = vld [vmem:[#allocation8 + $0x48] sm:$0xff]  ;;  %p1230_p6 = scmp.ne.s32.totalorder %s672_s0, %s1229_s21  ;;  %p1235_p8 = scmp.lt.s32.totalorder %s1229_s21, %s1229_s21 }
  0x72   :  { %1008 = vmatpush3.bf16.msra.mxu1 %v1005_v3  ;;  %v1017_v13 = vpack.c.bf16 %v281_v11, %v280_v10  ;;  %v1021_v16 = vpack.c.bf16 %v283_v15, %v282_v14  ;;  %v284_v17 = vld [vmem:[#allocation8 + $0x50] sm:$0xff]  ;;  %v285_v18 = vld [vmem:[#allocation8 + $0x58] sm:$0xff]  ;;  %v110_v19 = vld [vmem:[#allocation11] sm:$0xff] }
  0x73   :  { %1010 = vmatprep.subr.bf16.mxu1 %v1009_v5  ;;  %855 = vmatprep.mubr.f32.mxu1 %v242_v12  ;;  %v111_v20 = vld [vmem:[#allocation11 + $0x8] sm:$0xff]  ;;  %v112_v21 = vld [vmem:[#allocation11 + $0x10] sm:$0xff]  ;;  %v113_v23 = vld [vmem:[#allocation11 + $0x18] sm:$0xff]  ;;  %v1025_v27 = vpack.c.bf16 %v285_v18, %v284_v17  ;;  %p1236_p9 = por %p1235_p8, %p1234_p7 }
  0x74   :  { %v973_v22 = vpack.c.bf16 %v111_v20, %v110_v19  ;;  %v977_v24 = vpack.c.bf16 %v113_v23, %v112_v21  ;;  %v114_v25 = vld [vmem:[#allocation11 + $0x20] sm:$0xff]  ;;  %v115_v26 = vld [vmem:[#allocation11 + $0x28] sm:$0xff]  ;;  %v116_v31 = vld [vmem:[#allocation11 + $0x30] sm:$0xff] }
  0x75   :  { %v286_v28 = vld [vmem:[#allocation8 + $0x60] sm:$0xff]  ;;  %v287_v29 = vld [vmem:[#allocation8 + $0x68] sm:$0xff]  ;;  %v981_v30 = vpack.c.bf16 %v115_v26, %v114_v25  ;;  %v106_v34 = vld [vmem:[#allocation6] sm:$0xff]  ;;  %p1237_p10 = pnand %p1236_p9, %p1230_p6 }
  0x76   :  { %1012 = vmatpush3.bf16.msra.mxu1 %v1009_v5  ;;  %974 = vmatprep.subr.bf16.mxu0 %v973_v22  ;;  %v117_v32 = vld [vmem:[#allocation11 + $0x38] sm:$0xff]  ;;  %v1029_v33 = vpack.c.bf16 %v287_v29, %v286_v28  ;;  %v288_v35 = vld [vmem:[#allocation8 + $0x70] sm:$0xff]  ;;  %v108_v37 = vmax.f32 %v106_v34, 0.0  ;;  %v118_v39 = vld [vmem:[#allocation11 + $0x40] sm:$0xff] }
  0x77   :  { %1014 = vmatprep.subr.bf16.mxu1 %v1013_v8  ;;  %976 = vmatpush3.bf16.msra.mxu0 %v973_v22  ;;  %v289_v36 = vld [vmem:[#allocation8 + $0x78] sm:$0xff]  ;;  %v985_v38 = vpack.c.bf16 %v117_v32, %v116_v31  ;;  %v119_v40 = vld [vmem:[#allocation11 + $0x48] sm:$0xff]  ;;  %v212_v46 = vld [vmem:[#allocation3 + $0x10] sm:$0xff] }
  0x78   :  { %978 = vmatprep.subr.bf16.mxu0 %v977_v24  ;;  %820 = vmatprep.mubr.f32.mxu0 %v108_v37  ;;  %v1033_v41 = vpack.c.bf16 %v289_v36, %v288_v35  ;;  %v989_v42 = vpack.c.bf16 %v119_v40, %v118_v39  ;;  %v211_v43 = vld [vmem:[#allocation3 + $0x8] sm:$0xff]  ;;  %v244_v49 = vmax.f32 %v212_v46, 0.0  ;;  %v213_v50 = vld [vmem:[#allocation3 + $0x18] sm:$0xff]  ;;  %v214_v53 = vld [vmem:[#allocation3 + $0x20] sm:$0xff] }
  0x79   :  { %v120_v44 = vld [vmem:[#allocation11 + $0x50] sm:$0xff]  ;;  %v121_v45 = vld [vmem:[#allocation11 + $0x58] sm:$0xff]  ;;  %v243_v47 = vmax.f32 %v211_v43, 0.0  ;;  %v122_v51 = vld [vmem:[#allocation11 + $0x60] sm:$0xff]  ;;  %v245_v54 = vmax.f32 %v213_v50, 0.0  ;;  %v246_v56 = vmax.f32 %v214_v53, 0.0 }
  0x7a   :  { %1016 = vmatpush3.bf16.msra.mxu1 %v1013_v8  ;;  %v993_v48 = vpack.c.bf16 %v121_v45, %v120_v44  ;;  %v123_v52 = vld [vmem:[#allocation11 + $0x68] sm:$0xff]  ;;  %v215_v57 = vld [vmem:[#allocation3 + $0x28] sm:$0xff]  ;;  %v216_v60 = vld [vmem:[#allocation3 + $0x30] sm:$0xff]  ;;  %v1271_v53 = vmov 0.0  }
  0x7b   :  { %1018 = vmatprep.subr.bf16.mxu1 %v1017_v13  ;;  %980 = vmatpush3.bf16.msra.mxu0 %v977_v24  ;;  %v997_v55 = vpack.c.bf16 %v123_v52, %v122_v51  ;;  %v124_v58 = vld [vmem:[#allocation11 + $0x70] sm:$0xff]  ;;  %v125_v59 = vld [vmem:[#allocation11 + $0x78] sm:$0xff]  ;;  %v247_v61 = vmax.f32 %v215_v57, 0.0  ;;  %v248_v63 = vmax.f32 %v216_v60, 0.0  ;;  %v217_v0 = vld [vmem:[#allocation3 + $0x38] sm:$0xff]  ;;  %v1269_v52 = vmov 0.0|0.0  }
  0x7c   :  { %982 = vmatprep.subr.bf16.mxu0 %v981_v30  ;;  %v1001_v62 = vpack.c.bf16 %v125_v59, %v124_v58  ;;  %v218_v1 = vld [vmem:[#allocation3 + $0x40] sm:$0xff]  ;;  %v107_v2 = vld [vmem:[#allocation6 + $0x8] sm:$0xff]  ;;  %v249_v3 = vmax.f32 %v217_v0, 0.0  ;;  %v220_v6 = vld [vmem:[#allocation3 + $0x50] sm:$0xff] }
  0x7d   :  { %v250_v4 = vmax.f32 %v218_v1, 0.0  ;;  %v219_v5 = vld [vmem:[#allocation3 + $0x48] sm:$0xff]  ;;  %v109_v7 = vmax.f32 %v107_v2, 0.0  ;;  %v252_v9 = vmax.f32 %v220_v6, 0.0  ;;  %v221_v10 = vld [vmem:[#allocation3 + $0x58] sm:$0xff]  ;;  %v222_v11 = vld [vmem:[#allocation3 + $0x60] sm:$0xff] }
  0x7e   :  { %1020 = vmatpush3.bf16.msra.mxu1 %v1017_v13  ;;  %v251_v8 = vmax.f32 %v219_v5, 0.0  ;;  %v253_v12 = vmax.f32 %v221_v10, 0.0  ;;  %v254_v13 = vmax.f32 %v222_v11, 0.0  ;;  %v223_v14 = vld [vmem:[#allocation3 + $0x68] sm:$0xff]  ;;  %v224_v15 = vld [vmem:[#allocation3 + $0x70] sm:$0xff]  ;;  %v225_v18 = vld [vmem:[#allocation3 + $0x78] sm:$0xff] }
  0x7f   :  { %1022 = vmatprep.subr.bf16.mxu1 %v1021_v16  ;;  %984 = vmatpush3.bf16.msra.mxu0 %v981_v30  ;;  %v256_v17 = vmax.f32 %v224_v15, 0.0  ;;  %v226_v19 = vld [vmem:[#allocation3 + $0x80] sm:$0xff]  ;;  %v257_v20 = vmax.f32 %v225_v18, 0.0  ;;  %v227_v22 = vld [vmem:[#allocation3 + $0x88] sm:$0xff]  ;;  %v228_v23 = vld [vmem:[#allocation3 + $0x90] sm:$0xff] }
  0x80   :  { %986 = vmatprep.subr.bf16.mxu0 %v985_v38  ;;  %v258_v21 = vmax.f32 %v226_v19, 0.0  ;;  %v259_v24 = vmax.f32 %v227_v22, 0.0  ;;  %v260_v25 = vmax.f32 %v228_v23, 0.0  ;;  %v229_v26 = vld [vmem:[#allocation3 + $0x98] sm:$0xff]  ;;  %v231_v30 = vld [vmem:[#allocation3 + $0xa8] sm:$0xff]  ;;  %v232_v31 = vld [vmem:[#allocation3 + $0xb0] sm:$0xff] }
  0x81   :  { %v261_v28 = vmax.f32 %v229_v26, 0.0  ;;  %v263_v32 = vmax.f32 %v231_v30, 0.0  ;;  %v233_v34 = vld [vmem:[#allocation3 + $0xb8] sm:$0xff]  ;;  %v234_v35 = vld [vmem:[#allocation3 + $0xc0] sm:$0xff]  ;;  %v236_v39 = vld [vmem:[#allocation3 + $0xd0] sm:$0xff] }
  0x82   :  { %1024 = vmatpush3.bf16.msra.mxu1 %v1021_v16  ;;  %v255_v16 = vmax.f32 %v223_v14, 0.0  ;;  %v265_v36 = vmax.f32 %v233_v34, 0.0  ;;  %v266_v37 = vmax.f32 %v234_v35, 0.0  ;;  %v238_v43 = vld [vmem:[#allocation3 + $0xe0] sm:$0xff]  ;;  %v239_v46 = vld [vmem:[#allocation3 + $0xe8] sm:$0xff]  ;;  %v241_v50 = vld [vmem:[#allocation3 + $0xf8] sm:$0xff] }
  0x83   :  { %1026 = vmatprep.subr.bf16.mxu1 %v1025_v27  ;;  %988 = vmatpush3.bf16.msra.mxu0 %v985_v38  ;;  %v235_v38 = vld [vmem:[#allocation3 + $0xc8] sm:$0xff]  ;;  %v270_v45 = vmax.f32 %v238_v43, 0.0  ;;  %v273_v51 = vmax.f32 %v241_v50, 0.0 }
  0x84   :  { %990 = vmatprep.subr.bf16.mxu0 %v989_v42  ;;  %v267_v40 = vmax.f32 %v235_v38, 0.0 }
  0x86   :  { %1028 = vmatpush3.bf16.msra.mxu1 %v1025_v27  ;;  %v230_v27 = vld [vmem:[#allocation3 + $0xa0] sm:$0xff] }
  0x87   :  { %1030 = vmatprep.subr.bf16.mxu1 %v1029_v33  ;;  %992 = vmatpush3.bf16.msra.mxu0 %v989_v42  ;;  %v262_v29 = vmax.f32 %v230_v27, 0.0  ;;  %v237_v42 = vld [vmem:[#allocation3 + $0xd8] sm:$0xff] }
  0x88   :  { %994 = vmatprep.subr.bf16.mxu0 %v993_v48  ;;  %v269_v44 = vmax.f32 %v237_v42, 0.0 }
  0x8a   :  { %1032 = vmatpush3.bf16.msra.mxu1 %v1029_v33  ;;  %v264_v33 = vmax.f32 %v232_v31, 0.0 }
  0x8b   :  { %1034 = vmatprep.subr.bf16.mxu1 %v1033_v41  ;;  %996 = vmatpush3.bf16.msra.mxu0 %v993_v48  ;;  %v271_v48 = vmax.f32 %v239_v46, 0.0 }
  0x8c   :  { %998 = vmatprep.subr.bf16.mxu0 %v997_v55 }
  0x8e   :  { %1036 = vmatpush3.bf16.msra.mxu1 %v1033_v41  ;;  %v268_v41 = vmax.f32 %v236_v39, 0.0 }
  0x8f   :  { %1000 = vmatpush3.bf16.msra.mxu0 %v997_v55  ;;  %1061 = vmatprep.subr.bf16.mxu1 %v1269_v52 }
  0x90   :  { %1002 = vmatprep.subr.bf16.mxu0 %v1001_v62 }
  0x91   :  { %856 = vmatmul.mubr.f32.vlgmr.msra.gmra.mrb[0].mxu1 %v243_v47  ;;  %v240_v47 = vld [vmem:[#allocation3 + $0xf0] sm:$0xff] }
  0x92   :  { %858 = vmatprep.mubr.f32.mxu1 %v244_v49  ;;  %v272_v49 = vmax.f32 %v240_v47, 0.0 }
  0x93   :  { %1004 = vmatpush3.bf16.msra.mxu0 %v1001_v62 }
  0x94   :  { %1037 = vmatprep.subr.bf16.mxu0 %v1269_v52 }
  0x95   :  { %859 = vmatmul.mubr.f32.gmra.mrb[2].mxu1 %v245_v54  ;;  %v1409_v54 = vld [vmem:[#allocation9] ss:$0 sm:$0xff] }
  0x96   :  { %861 = vmatprep.mubr.f32.mxu1 %v246_v56  ;;  %821 = vmatmul.mubr.f32.vlgmr.msra.gmra.mrb[0].mxu0 %v109_v7 }
  0x97   :  { %935 = vmatprep.mubr.msk.f32.mxu0 %vm1270_vm0, %v1271_v53 }
  0x99   :  { %862 = vmatmul.mubr.f32.gmra.mrb[4].mxu1 %v247_v61 }
  0x9a   :  { %864 = vmatprep.mubr.f32.mxu1 %v248_v63 }
  0x9d   :  { %865 = vmatmul.mubr.f32.gmra.mrb[6].mxu1 %v249_v3 }
  0x9e   :  { %867 = vmatprep.mubr.f32.mxu1 %v250_v4 }
  0xa1   :  { %868 = vmatmul.mubr.f32.gmra.mrb[8].mxu1 %v251_v8 }
  0xa2   :  { %870 = vmatprep.mubr.f32.mxu1 %v252_v9 }
  0xa5   :  { %871 = vmatmul.mubr.f32.gmra.mrb[10].mxu1 %v253_v12 }
  0xa6   :  { %873 = vmatprep.mubr.f32.mxu1 %v254_v13 }
  0xa9   :  { %874 = vmatmul.mubr.f32.gmra.mrb[12].mxu1 %v255_v16 }
  0xaa   :  { %876 = vmatprep.mubr.f32.mxu1 %v256_v17 }
  0xad   :  { %877 = vmatmul.mubr.f32.gmra.mrb[14].mxu1 %v257_v20 }
  0xae   :  { %879 = vmatprep.mubr.f32.mxu1 %v258_v21 }
  0xb1   :  { %880 = vmatmul.mubr.f32.gmra.mrb[16].mxu1 %v259_v24 }
  0xb2   :  { %882 = vmatprep.mubr.f32.mxu1 %v260_v25 }
  0xb5   :  { %883 = vmatmul.mubr.f32.gmra.mrb[18].mxu1 %v261_v28 }
  0xb6   :  { %885 = vmatprep.mubr.f32.mxu1 %v262_v29 }
  0xb9   :  { %886 = vmatmul.mubr.f32.gmra.mrb[20].mxu1 %v263_v32 }
  0xba   :  { %888 = vmatprep.mubr.f32.mxu1 %v264_v33 }
  0xbd   :  { %889 = vmatmul.mubr.f32.gmra.mrb[22].mxu1 %v265_v36 }
  0xbe   :  { %891 = vmatprep.mubr.f32.mxu1 %v266_v37 }
  0xc1   :  { %892 = vmatmul.mubr.f32.gmra.mrb[24].mxu1 %v267_v40 }
  0xc2   :  { %894 = vmatprep.mubr.f32.mxu1 %v268_v41 }
  0xc5   :  { %895 = vmatmul.mubr.f32.gmra.mrb[26].mxu1 %v269_v44 }
  0xc6   :  { %897 = vmatprep.mubr.f32.mxu1 %v270_v45 }
  0xc9   :  { %898 = vmatmul.mubr.f32.gmra.mrb[28].mxu1 %v271_v48 }
  0xca   :  { %900 = vmatprep.mubr.f32.mxu1 %v272_v49 }
  0xcd   :  { %901 = vmatmul.mubr.f32.gmra.mrb[30].mxu1 %v273_v51 }
  0xce   :  { %970 = vmatprep.mubr.msk.f32.mxu1 %vm1270_vm0, %v1271_v53 }
 0x164   :  { %v857_v55 = vpop.f32.mrb[0].mxu1 }
 0x165   :  { %v369_v56 = vadd.f32 %v857_v55, %v1409_v54  ;;  %v363_v57 = vpop.f32.mrb[1].mxu1 }
 0x166   :  { %v364_v58 = vadd.f32 %v1409_v54, %v363_v57 }
 0x168   :  { %v1038_v59 = vpack.c.bf16 %v369_v56, %v364_v58  ;;  %v860_v60 = vpop.f32.mrb[2].mxu1 }
 0x169   :  { %v379_v61 = vadd.f32 %v860_v60, %v1409_v54  ;;  %v373_v62 = vpop.f32.mrb[3].mxu1  ;;  %v1420_v10 = vpop.f32.mrb[0].mxu0 }
 0x16a   :  { %v374_v63 = vadd.f32 %v1409_v54, %v373_v62  ;;  %1039 = vmatpush3.bf16.xpose.msra.mxu0 %v1038_v59  ;;  %v1423_v11 = vpop.f32.mrb[1].mxu0 }
 0x16b   :  { %1040 = vmatprep.subr.bf16.mxu0 %v1269_v52 }
 0x16c   :  { %v1041_v0 = vpack.c.bf16 %v379_v61, %v374_v63  ;;  %v863_v1 = vpop.f32.mrb[4].mxu1 }
 0x16d   :  { %v389_v2 = vadd.f32 %v863_v1, %v1409_v54  ;;  %v383_v3 = vpop.f32.mrb[5].mxu1 }
 0x16e   :  { %v384_v4 = vadd.f32 %v1409_v54, %v383_v3 }
 0x170   :  { %v1044_v5 = vpack.c.bf16 %v389_v2, %v384_v4  ;;  %v866_v6 = vpop.f32.mrb[6].mxu1 }
 0x171   :  { %v399_v7 = vadd.f32 %v866_v6, %v1409_v54  ;;  %v393_v8 = vpop.f32.mrb[7].mxu1 }
 0x172   :  { %v394_v9 = vadd.f32 %v1409_v54, %v393_v8  ;;  %1042 = vmatpush3.bf16.xpose.msra.mxu0 %v1041_v0 }
 0x173   :  { %1043 = vmatprep.subr.bf16.mxu0 %v1269_v52 }
 0x174   :  { %v1047_v12 = vpack.c.bf16 %v399_v7, %v394_v9  ;;  %v869_v13 = vpop.f32.mrb[8].mxu1 }
 0x175   :  { %v409_v14 = vadd.f32 %v869_v13, %v1409_v54  ;;  %v403_v15 = vpop.f32.mrb[9].mxu1 }
 0x176   :  { %v404_v16 = vadd.f32 %v1409_v54, %v403_v15 }
 0x178   :  { %v1050_v17 = vpack.c.bf16 %v409_v14, %v404_v16  ;;  %v872_v18 = vpop.f32.mrb[10].mxu1 }
 0x179   :  { %v419_v19 = vadd.f32 %v872_v18, %v1409_v54  ;;  %v413_v20 = vpop.f32.mrb[11].mxu1 }
 0x17a   :  { %v414_v21 = vadd.f32 %v1409_v54, %v413_v20  ;;  %1045 = vmatpush3.bf16.xpose.msra.mxu0 %v1044_v5 }
 0x17b   :  { %1046 = vmatprep.subr.bf16.mxu0 %v1269_v52 }
 0x17c   :  { %v1053_v22 = vpack.c.bf16 %v419_v19, %v414_v21  ;;  %v875_v23 = vpop.f32.mrb[12].mxu1 }
 0x17d   :  { %v429_v24 = vadd.f32 %v875_v23, %v1409_v54  ;;  %v423_v25 = vpop.f32.mrb[13].mxu1 }
 0x17e   :  { %v424_v26 = vadd.f32 %v1409_v54, %v423_v25 }
 0x180   :  { %v1056_v27 = vpack.c.bf16 %v429_v24, %v424_v26  ;;  %v878_v28 = vpop.f32.mrb[14].mxu1 }
 0x181   :  { %v439_v29 = vadd.f32 %v878_v28, %v1409_v54  ;;  %v433_v30 = vpop.f32.mrb[15].mxu1 }
 0x182   :  { %v434_v31 = vadd.f32 %v1409_v54, %v433_v30  ;;  %1048 = vmatpush3.bf16.xpose.msra.mxu0 %v1047_v12  ;;  %v686_v12 = vld [vmem:[#allocation12] ss:$0 sm:$0xff] }
 0x183   :  { %1049 = vmatprep.subr.bf16.mxu0 %v1269_v52  ;;  %v200_v14 = vadd.f32 %v686_v12, %v1423_v11  ;;  %v205_v15 = vadd.f32 %v1420_v10, %v686_v12 }
 0x184   :  { %v1059_v32 = vpack.c.bf16 %v439_v29, %v434_v31  ;;  %v881_v33 = vpop.f32.mrb[16].mxu1 }
 0x185   :  { %v449_v34 = vadd.f32 %v881_v33, %v1409_v54  ;;  %v443_v35 = vpop.f32.mrb[17].mxu1 }
 0x186   :  { %v444_v36 = vadd.f32 %v1409_v54, %v443_v35 }
 0x188   :  { %v1062_v37 = vpack.c.bf16 %v449_v34, %v444_v36  ;;  %v884_v38 = vpop.f32.mrb[18].mxu1 }
 0x189   :  { %v459_v39 = vadd.f32 %v884_v38, %v1409_v54  ;;  %v453_v40 = vpop.f32.mrb[19].mxu1 }
 0x18a   :  { %1051 = vmatpush3.bf16.xpose.msra.mxu0 %v1050_v17  ;;  %1063 = vmatpush3.bf16.xpose.msra.mxu1 %v1062_v37  ;;  %v454_v41 = vadd.f32 %v1409_v54, %v453_v40 }
 0x18b   :  { %1052 = vmatprep.subr.bf16.mxu0 %v1269_v52  ;;  %1064 = vmatprep.subr.bf16.mxu1 %v1269_v52 }
 0x18c   :  { %v1065_v42 = vpack.c.bf16 %v459_v39, %v454_v41  ;;  %v887_v43 = vpop.f32.mrb[20].mxu1 }
 0x18d   :  { %v469_v44 = vadd.f32 %v887_v43, %v1409_v54  ;;  %v463_v45 = vpop.f32.mrb[21].mxu1 }
 0x18e   :  { %v464_v46 = vadd.f32 %v1409_v54, %v463_v45 }
 0x190   :  { %v1068_v47 = vpack.c.bf16 %v469_v44, %v464_v46  ;;  %v890_v48 = vpop.f32.mrb[22].mxu1 }
 0x191   :  { %v479_v49 = vadd.f32 %v890_v48, %v1409_v54  ;;  %v473_v50 = vpop.f32.mrb[23].mxu1 }
 0x192   :  { %1054 = vmatpush3.bf16.xpose.msra.mxu0 %v1053_v22  ;;  %1066 = vmatpush3.bf16.xpose.msra.mxu1 %v1065_v42  ;;  %v474_v51 = vadd.f32 %v1409_v54, %v473_v50 }
 0x193   :  { %1055 = vmatprep.subr.bf16.mxu0 %v1269_v52  ;;  %1067 = vmatprep.subr.bf16.mxu1 %v1269_v52 }
 0x194   :  { %v1071_v53 = vpack.c.bf16 %v479_v49, %v474_v51  ;;  %v893_v55 = vpop.f32.mrb[24].mxu1 }
 0x195   :  { %v489_v56 = vadd.f32 %v893_v55, %v1409_v54  ;;  %v483_v57 = vpop.f32.mrb[25].mxu1 }
 0x196   :  { %v484_v58 = vadd.f32 %v1409_v54, %v483_v57 }
 0x198   :  { %v1074_v59 = vpack.c.bf16 %v489_v56, %v484_v58  ;;  %v896_v60 = vpop.f32.mrb[26].mxu1 }
 0x199   :  { %v499_v61 = vadd.f32 %v896_v60, %v1409_v54  ;;  %v493_v62 = vpop.f32.mrb[27].mxu1 }
 0x19a   :  { %1057 = vmatpush3.bf16.xpose.msra.mxu0 %v1056_v27  ;;  %1069 = vmatpush3.bf16.xpose.msra.mxu1 %v1068_v47  ;;  %v494_v63 = vadd.f32 %v1409_v54, %v493_v62 }
 0x19b   :  { %1058 = vmatprep.subr.bf16.mxu0 %v1269_v52  ;;  %1070 = vmatprep.subr.bf16.mxu1 %v1269_v52 }
 0x19c   :  { %v1077_v0 = vpack.c.bf16 %v499_v61, %v494_v63  ;;  %v899_v1 = vpop.f32.mrb[28].mxu1 }
 0x19d   :  { %v509_v2 = vadd.f32 %v899_v1, %v1409_v54  ;;  %v503_v3 = vpop.f32.mrb[29].mxu1 }
 0x19e   :  { %v504_v4 = vadd.f32 %v1409_v54, %v503_v3 }
 0x1a0   :  { %v1080_v5 = vpack.c.bf16 %v509_v2, %v504_v4  ;;  %v902_v6 = vpop.f32.mrb[30].mxu1 }
 0x1a1   :  { %v519_v7 = vadd.f32 %v902_v6, %v1409_v54  ;;  %v513_v8 = vpop.f32.mrb[31].mxu1 }
 0x1a2   :  { %1060 = vmatpush3.bf16.xpose.msra.mxu0 %v1059_v32  ;;  %1072 = vmatpush3.bf16.xpose.msra.mxu1 %v1071_v53  ;;  %v514_v9 = vadd.f32 %v1409_v54, %v513_v8 }
 0x1a3   :  { %1073 = vmatprep.subr.bf16.mxu1 %v1269_v52 }
 0x1a4   :  { %v1083_v13 = vpack.c.bf16 %v519_v7, %v514_v9 }
 0x1a9   :  { %936 = vmatmul.mubr.f32.vlgmr.msra.gmra.mrb[2].mxu0 %v200_v14 }
 0x1aa   :  { %1075 = vmatpush3.bf16.xpose.msra.mxu1 %v1074_v59 }
 0x1ab   :  { %1076 = vmatprep.subr.bf16.mxu1 %v1269_v52 }
 0x1b2   :  { %1078 = vmatpush3.bf16.xpose.msra.mxu1 %v1077_v0 }
 0x1b3   :  { %1079 = vmatprep.subr.bf16.mxu1 %v1269_v52 }
 0x1ba   :  { %1081 = vmatpush3.bf16.xpose.msra.mxu1 %v1080_v5 }
 0x1bb   :  { %1082 = vmatprep.subr.bf16.mxu1 %v1269_v52 }
 0x1c2   :  { %1084 = vmatpush3.bf16.xpose.msra.mxu1 %v1083_v13 }
 0x1c9   :  { %971 = vmatmul.mubr.f32.vlgmr.msra.gmra.mrb[32].mxu1 %v205_v15 }
 0x27c   :  { %v590_v54 = vpop.f32.mrb[2].mxu0 }
 0x27d   :  { %664 = vst [vmem:[#allocation14] sm:$0xff] %v590_v54  ;;  %v937_v16 = vpop.f32.mrb[3].mxu0 }
 0x29c   :  { %v660_v11 = vpop.f32.mrb[32].mxu1 }
 0x29d   :  { %665 = vst [vmem:[#allocation14 + $0x8] sm:$0xff] %v660_v11  ;;  %v972_v17 = vpop.f32.mrb[33].mxu1 }
 0x29e   :  { %1240 = shalt.err (!%p1237_p10)
}
 0x29f   :  { %s1241_s25 = scalar_lea.hbm %s1484_s6, 256 }
 0x2a0   :  { %p1242_p11 = scmp.ne.s32.totalorder %s1484_s6, %s1241_s25  ;;  %p1245_p12 = scmp.lt.u32.totalorder %s1241_s25, %s1484_s6 }
 0x2a2   :  { %p1247_p13 = pnand %p1245_p12, %p1242_p11 }
 0x2a4   :  { %1250 = shalt.err (!%p1247_p13)
}
 0x2a5   :  { %677 = dma.vmem_to_hbm [thread:$0]  %s672_s0, 256, %s1484_s6, [#allocation5], %s1263_s9, %s1263_s9, %s1264_s10  }
 0x2a6   :  { %1259 = dma.done.wait [#allocation5], 256  }
 0x2a7   :  { %1260 = vsyncadd [#allocation5], 4294967040 }
 0x2a8   :  { %681 = vsyncpa [#allocation4], 1 }
 0x2a9   :  { %682 = vsyncpa [#allocation7], 1 }
 0x2aa   :  { %683 = vsyncpa [#allocation10], 1 }
 0x2ab   :  { %684 = vsyncpa [#allocation13], 1 }
 0x2ac   :  { %685 = vsyncpa [#allocation5], 1 }

</bundles_post_ra>
